<compile_context>
chip_gen: v7x
topology: tpu7x:2x2x1
jax: 0.10.0
libtpu: 0.0.40
codegen_flags: <defaults>
</compile_context>

<pallas_src>
from functools import partial

import jax
import jax.numpy as jnp
from jax.experimental import pallas as pl
from jax.experimental.pallas import tpu as pltpu


def _mixer_kernel(x_ref, w_ref, scale_ref, shift_ref, bias_ref, o_ref, *,
                  activation):
    w = w_ref[...]                                   # (P, P)  matmul dtype
    scale = scale_ref[...].astype(jnp.float32)       # (P, 1)  BN scale
    shift = shift_ref[...].astype(jnp.float32)       # (P, 1)  BN shift
    bias = bias_ref[...].astype(jnp.float32)         # (P, 1)  = W @ bn_shift + conv_b

    bs = x_ref.shape[0]
    for i in range(bs):                              # static unroll over slabs
        x = x_ref[i].astype(jnp.float32)             # (P, bd)
        xs = x * scale                               # BN scale (shift folded into bias)
        y = jnp.dot(w, xs.astype(w.dtype),
                    preferred_element_type=jnp.float32) + bias
        if activation == 'gelu':
            # Exact-erf GELU (matches torch.nn.GELU() default)
            y = 0.5 * y * (1.0 + jax.lax.erf(y * 0.7071067811865476))
        elif activation == 'relu':
            y = jnp.maximum(y, 0.0)
        # Dropout: identity in eval/inference mode.
        # TODO(synk): training-mode dropout (random mask * 1/(1-p)) not implemented.
        o_ref[i] = (xs + shift + y).astype(o_ref.dtype)


def _pick_lane_block(d, p, itemsize, max_block_bytes=2 << 20):
    """Lane-dim block: full d if one (P, d) slab fits the budget, else the
    largest multiple-of-128 divisor of d that does (lane blocks must be a
    multiple of 128 or the full dim)."""
    if p * d * itemsize <= max_block_bytes:
        return d
    cap = max(128, (max_block_bytes // (p * itemsize)) // 128 * 128)
    c = cap
    while c >= 128:
        if d % c == 0:
            return c
        c -= 128
    return d  # fallback: no valid 128-multiple divisor; take the whole dim


def _pick_slab_block(s, p, bd, itemsize, target_bytes=1 << 20, max_unroll=16):
    """Leading (slab) block: largest divisor of s within the byte/unroll budget."""
    per_slab = max(1, p * bd * itemsize)
    cap = max(1, min(max_unroll, target_bytes // per_slab))
    best = 1
    for c in range(1, s + 1):
        if s % c == 0 and c <= cap:
            best = c
    return best


def conv_inter_patch_mixer(x, gamma, beta, running_mean, running_var,
                           conv_w, conv_b, *, eps=1e-5, activation='gelu',
                           dropout_factor=0.0):
    """x: (B, A, P, L) with P = num_patches at dim 2 (as the module expects:
    its internal swapaxes(1, 2) moves P into the BatchNorm2d/Conv2d channel
    slot).  Returns the same shape."""
    del dropout_factor  # inference-mode dropout == identity
    B, A, P, L = x.shape

    # Fold BatchNorm2d (inference) into per-patch scale/shift.
    inv_std = 1.0 / jnp.sqrt(running_var.astype(jnp.float32) + eps)
    scale = gamma.astype(jnp.float32) * inv_std                              # (P,)
    shift = beta.astype(jnp.float32) - running_mean.astype(jnp.float32) * scale

    # conv_w: (P, P, 1, 1) -> (P, P); fold conv bias with W @ bn_shift.
    w = conv_w.reshape(P, P).astype(jnp.float32)
    fused_bias = w @ shift + conv_b.astype(jnp.float32)                      # (P,)

    mm_dtype = jnp.bfloat16 if x.dtype == jnp.bfloat16 else jnp.float32
    w_k = w.astype(mm_dtype)

    S = B * A
    x3 = x.reshape(S, P, L)          # contiguous view; no data movement

    itemsize = x.dtype.itemsize
    bd = _pick_lane_block(L, P, itemsize)
    bs = _pick_slab_block(S, P, bd, itemsize)

    out3 = pl.pallas_call(
        partial(_mixer_kernel, activation=activation),
        out_shape=jax.ShapeDtypeStruct((S, P, L), x.dtype),
        grid_spec=pltpu.PrefetchScalarGridSpec(
            num_scalar_prefetch=0,
            grid=(S // bs, L // bd),
            in_specs=[
                pl.BlockSpec((bs, P, bd), lambda i, j: (i, 0, j)),   # x slabs
                pl.BlockSpec((P, P), lambda i, j: (0, 0)),           # W (constant)
                pl.BlockSpec((P, 1), lambda i, j: (0, 0)),           # bn scale
                pl.BlockSpec((P, 1), lambda i, j: (0, 0)),           # bn shift
                pl.BlockSpec((P, 1), lambda i, j: (0, 0)),           # fused bias
            ],
            out_specs=pl.BlockSpec((bs, P, bd), lambda i, j: (i, 0, j)),
        ),
        compiler_params=pltpu.CompilerParams(
            dimension_semantics=("parallel", "parallel"),
            vmem_limit_bytes=32 * 1024 * 1024),
    )(x3, w_k, scale.reshape(P, 1), shift.reshape(P, 1),
      fused_bias.reshape(P, 1))

    return out3.reshape(B, A, P, L)


def _reference(x, gamma, beta, running_mean, running_var, conv_w, conv_b,
               *, eps=1e-5, activation='gelu'):
    """Pure-JAX mirror of the PyTorch forward (inference semantics)."""
    P = conv_b.shape[0]
    xs = jnp.swapaxes(x, 1, 2)                                  # (B, P, A, L)
    inv = 1.0 / jnp.sqrt(running_var + eps)
    xn = ((xs - running_mean[None, :, None, None]) * inv[None, :, None, None]
          * gamma[None, :, None, None] + beta[None, :, None, None])
    w = conv_w.reshape(P, P)
    y = jnp.einsum('pq,bqal->bpal', w, xn) + conv_b[None, :, None, None]
    if activation == 'gelu':
        y = 0.5 * y * (1.0 + jax.lax.erf(y / jnp.sqrt(2.0)))
    elif activation == 'relu':
        y = jnp.maximum(y, 0.0)
    y = jnp.swapaxes(y, 1, 2)
    xn = jnp.swapaxes(xn, 1, 2)
    return xn + y


if __name__ == "__main__":
    key = jax.random.PRNGKey(0)
    k_x, k_g, k_b, k_m, k_v, k_w, k_cb = jax.random.split(key, 7)

    # x: (batch, channels, num_patches, hidden).  The module's swapaxes(1, 2)
    # puts num_patches (dim 2) into the BatchNorm2d / Conv2d channel slot.
    B, C, P, L = 2, 4, 16, 128
    x = jax.random.normal(k_x, (B, C, P, L), dtype=jnp.float32)

    gamma = jax.random.normal(k_g, (P,), dtype=jnp.float32) * 0.1 + 1.0
    beta = jax.random.normal(k_b, (P,), dtype=jnp.float32) * 0.1
    running_mean = jax.random.normal(k_m, (P,), dtype=jnp.float32) * 0.1
    running_var = jax.random.uniform(k_v, (P,), dtype=jnp.float32,
                                     minval=0.5, maxval=1.5)
    conv_w = jax.random.normal(k_w, (P, P, 1, 1), dtype=jnp.float32) * 0.2
    conv_b = jax.random.normal(k_cb, (P,), dtype=jnp.float32) * 0.1

    out = conv_inter_patch_mixer(x, gamma, beta, running_mean, running_var,
                                 conv_w, conv_b, activation='gelu',
                                 dropout_factor=0.1)
    out = jax.block_until_ready(out)

    ref = _reference(x, gamma, beta, running_mean, running_var, conv_w, conv_b,
                     activation='gelu')
    assert out.shape == (B, C, P, L)
    assert jnp.allclose(out, ref, atol=1e-4, rtol=1e-4), float(
        jnp.max(jnp.abs(out - ref)))

    print("KERNEL_OK")
</pallas_src>

<mosaic_0001>
module attributes {stable_mosaic.version = 11 : i64} {
  func.func @_mixer_kernel(%arg0: i32, %arg1: i32, %arg2: memref<8x16x128xf32, #tpu.memory_space<vmem>>, %arg3: memref<16x16xf32, #tpu.memory_space<vmem>>, %arg4: memref<16x1xf32, #tpu.memory_space<vmem>>, %arg5: memref<16x1xf32, #tpu.memory_space<vmem>>, %arg6: memref<16x1xf32, #tpu.memory_space<vmem>>, %arg7: memref<8x16x128xf32, #tpu.memory_space<vmem>>) attributes {dimension_semantics = [#tpu.dimension_semantics<parallel>, #tpu.dimension_semantics<parallel>], iteration_bounds = array<i64: 1, 1>, scalar_prefetch = 0 : i64, scratch_operands = 0 : i64, tpu.core_type = #tpu.core_type<tc>, window_params = [{transform_indices = @transform_0, window_bounds = array<i64: 8, 16, 128>}, {pipeline_mode = #tpu.pipeline_mode<synchronous>, transform_indices = @transform_1, window_bounds = array<i64: 16, 16>}, {pipeline_mode = #tpu.pipeline_mode<synchronous>, transform_indices = @transform_2, window_bounds = array<i64: 16, 1>}, {pipeline_mode = #tpu.pipeline_mode<synchronous>, transform_indices = @transform_3, window_bounds = array<i64: 16, 1>}, {pipeline_mode = #tpu.pipeline_mode<synchronous>, transform_indices = @transform_4, window_bounds = array<i64: 16, 1>}, {transform_indices = @transform_5, window_bounds = array<i64: 8, 16, 128>}]} {
    %c0 = arith.constant 0 : index
    %c0_0 = arith.constant 0 : index
    %0 = vector.load %arg3[%c0, %c0_0] : memref<16x16xf32, #tpu.memory_space<vmem>>, vector<16x16xf32>
    %c0_1 = arith.constant 0 : index
    %c0_2 = arith.constant 0 : index
    %1 = vector.load %arg4[%c0_1, %c0_2] : memref<16x1xf32, #tpu.memory_space<vmem>>, vector<16x1xf32>
    %c0_3 = arith.constant 0 : index
    %c0_4 = arith.constant 0 : index
    %2 = vector.load %arg5[%c0_3, %c0_4] : memref<16x1xf32, #tpu.memory_space<vmem>>, vector<16x1xf32>
    %c0_5 = arith.constant 0 : index
    %c0_6 = arith.constant 0 : index
    %3 = vector.load %arg6[%c0_5, %c0_6] : memref<16x1xf32, #tpu.memory_space<vmem>>, vector<16x1xf32>
    %c0_7 = arith.constant 0 : index
    %c0_8 = arith.constant 0 : index
    %c0_9 = arith.constant 0 : index
    %4 = vector.load %arg2[%c0_7, %c0_8, %c0_9] : memref<8x16x128xf32, #tpu.memory_space<vmem>>, vector<1x16x128xf32>
    %5 = vector.shape_cast %4 : vector<1x16x128xf32> to vector<16x128xf32>
    %6 = vector.broadcast %1 : vector<16x1xf32> to vector<16x128xf32>
    %7 = arith.mulf %5, %6 : vector<16x128xf32>
    %cst = arith.constant dense<0.000000e+00> : vector<16x128xf32>
    %8 = tpu.matmul %0, %7, %cst {dimension_numbers = #tpu.dot_dimension_numbers<[1], [0], [0], [1], [0, 0, 1, 1], [], []>} : vector<16x16xf32>, vector<16x128xf32>, vector<16x128xf32> -> vector<16x128xf32>
    %9 = vector.broadcast %3 : vector<16x1xf32> to vector<16x128xf32>
    %10 = arith.addf %8, %9 : vector<16x128xf32>
    %cst_10 = arith.constant 5.000000e-01 : f32
    %11 = vector.broadcast %cst_10 : f32 to vector<16x128xf32>
    %12 = arith.mulf %11, %10 : vector<16x128xf32>
    %cst_11 = arith.constant 0.707106769 : f32
    %13 = vector.broadcast %cst_11 : f32 to vector<16x128xf32>
    %14 = arith.mulf %10, %13 : vector<16x128xf32>
    %15 = math.erf %14 : vector<16x128xf32>
    %cst_12 = arith.constant 1.000000e+00 : f32
    %16 = vector.broadcast %cst_12 : f32 to vector<16x128xf32>
    %17 = arith.addf %16, %15 : vector<16x128xf32>
    %18 = arith.mulf %12, %17 : vector<16x128xf32>
    %19 = vector.broadcast %2 : vector<16x1xf32> to vector<16x128xf32>
    %20 = arith.addf %7, %19 : vector<16x128xf32>
    %21 = arith.addf %20, %18 : vector<16x128xf32>
    %c0_13 = arith.constant 0 : index
    %c0_14 = arith.constant 0 : index
    %c0_15 = arith.constant 0 : index
    %22 = vector.load %arg7[%c0_13, %c0_14, %c0_15] : memref<8x16x128xf32, #tpu.memory_space<vmem>>, vector<1x16x128xf32>
    %23 = vector.shape_cast %22 : vector<1x16x128xf32> to vector<16x128xf32>
    %24 = vector.shape_cast %21 : vector<16x128xf32> to vector<1x16x128xf32>
    tpu.vector_store %arg7[%c0_13, %c0_14, %c0_15], %24 {strides = array<i32>} : memref<8x16x128xf32, #tpu.memory_space<vmem>>, vector<1x16x128xf32>,
    %c1 = arith.constant 1 : index
    %c0_16 = arith.constant 0 : index
    %c0_17 = arith.constant 0 : index
    %25 = vector.load %arg2[%c1, %c0_16, %c0_17] : memref<8x16x128xf32, #tpu.memory_space<vmem>>, vector<1x16x128xf32>
    %26 = vector.shape_cast %25 : vector<1x16x128xf32> to vector<16x128xf32>
    %27 = vector.broadcast %1 : vector<16x1xf32> to vector<16x128xf32>
    %28 = arith.mulf %26, %27 : vector<16x128xf32>
    %cst_18 = arith.constant dense<0.000000e+00> : vector<16x128xf32>
    %29 = tpu.matmul %0, %28, %cst_18 {dimension_numbers = #tpu.dot_dimension_numbers<[1], [0], [0], [1], [0, 0, 1, 1], [], []>} : vector<16x16xf32>, vector<16x128xf32>, vector<16x128xf32> -> vector<16x128xf32>
    %30 = vector.broadcast %3 : vector<16x1xf32> to vector<16x128xf32>
    %31 = arith.addf %29, %30 : vector<16x128xf32>
    %cst_19 = arith.constant 5.000000e-01 : f32
    %32 = vector.broadcast %cst_19 : f32 to vector<16x128xf32>
    %33 = arith.mulf %32, %31 : vector<16x128xf32>
    %cst_20 = arith.constant 0.707106769 : f32
    %34 = vector.broadcast %cst_20 : f32 to vector<16x128xf32>
    %35 = arith.mulf %31, %34 : vector<16x128xf32>
    %36 = math.erf %35 : vector<16x128xf32>
    %cst_21 = arith.constant 1.000000e+00 : f32
    %37 = vector.broadcast %cst_21 : f32 to vector<16x128xf32>
    %38 = arith.addf %37, %36 : vector<16x128xf32>
    %39 = arith.mulf %33, %38 : vector<16x128xf32>
    %40 = vector.broadcast %2 : vector<16x1xf32> to vector<16x128xf32>
    %41 = arith.addf %28, %40 : vector<16x128xf32>
    %42 = arith.addf %41, %39 : vector<16x128xf32>
    %c1_22 = arith.constant 1 : index
    %c0_23 = arith.constant 0 : index
    %c0_24 = arith.constant 0 : index
    %43 = vector.load %arg7[%c1_22, %c0_23, %c0_24] : memref<8x16x128xf32, #tpu.memory_space<vmem>>, vector<1x16x128xf32>
    %44 = vector.shape_cast %43 : vector<1x16x128xf32> to vector<16x128xf32>
    %45 = vector.shape_cast %42 : vector<16x128xf32> to vector<1x16x128xf32>
    tpu.vector_store %arg7[%c1_22, %c0_23, %c0_24], %45 {strides = array<i32>} : memref<8x16x128xf32, #tpu.memory_space<vmem>>, vector<1x16x128xf32>,
    %c2 = arith.constant 2 : index
    %c0_25 = arith.constant 0 : index
    %c0_26 = arith.constant 0 : index
    %46 = vector.load %arg2[%c2, %c0_25, %c0_26] : memref<8x16x128xf32, #tpu.memory_space<vmem>>, vector<1x16x128xf32>
    %47 = vector.shape_cast %46 : vector<1x16x128xf32> to vector<16x128xf32>
    %48 = vector.broadcast %1 : vector<16x1xf32> to vector<16x128xf32>
    %49 = arith.mulf %47, %48 : vector<16x128xf32>
    %cst_27 = arith.constant dense<0.000000e+00> : vector<16x128xf32>
    %50 = tpu.matmul %0, %49, %cst_27 {dimension_numbers = #tpu.dot_dimension_numbers<[1], [0], [0], [1], [0, 0, 1, 1], [], []>} : vector<16x16xf32>, vector<16x128xf32>, vector<16x128xf32> -> vector<16x128xf32>
    %51 = vector.broadcast %3 : vector<16x1xf32> to vector<16x128xf32>
    %52 = arith.addf %50, %51 : vector<16x128xf32>
    %cst_28 = arith.constant 5.000000e-01 : f32
    %53 = vector.broadcast %cst_28 : f32 to vector<16x128xf32>
    %54 = arith.mulf %53, %52 : vector<16x128xf32>
    %cst_29 = arith.constant 0.707106769 : f32
    %55 = vector.broadcast %cst_29 : f32 to vector<16x128xf32>
    %56 = arith.mulf %52, %55 : vector<16x128xf32>
    %57 = math.erf %56 : vector<16x128xf32>
    %cst_30 = arith.constant 1.000000e+00 : f32
    %58 = vector.broadcast %cst_30 : f32 to vector<16x128xf32>
    %59 = arith.addf %58, %57 : vector<16x128xf32>
    %60 = arith.mulf %54, %59 : vector<16x128xf32>
    %61 = vector.broadcast %2 : vector<16x1xf32> to vector<16x128xf32>
    %62 = arith.addf %49, %61 : vector<16x128xf32>
    %63 = arith.addf %62, %60 : vector<16x128xf32>
    %c2_31 = arith.constant 2 : index
    %c0_32 = arith.constant 0 : index
    %c0_33 = arith.constant 0 : index
    %64 = vector.load %arg7[%c2_31, %c0_32, %c0_33] : memref<8x16x128xf32, #tpu.memory_space<vmem>>, vector<1x16x128xf32>
    %65 = vector.shape_cast %64 : vector<1x16x128xf32> to vector<16x128xf32>
    %66 = vector.shape_cast %63 : vector<16x128xf32> to vector<1x16x128xf32>
    tpu.vector_store %arg7[%c2_31, %c0_32, %c0_33], %66 {strides = array<i32>} : memref<8x16x128xf32, #tpu.memory_space<vmem>>, vector<1x16x128xf32>,
    %c3 = arith.constant 3 : index
    %c0_34 = arith.constant 0 : index
    %c0_35 = arith.constant 0 : index
    %67 = vector.load %arg2[%c3, %c0_34, %c0_35] : memref<8x16x128xf32, #tpu.memory_space<vmem>>, vector<1x16x128xf32>
    %68 = vector.shape_cast %67 : vector<1x16x128xf32> to vector<16x128xf32>
    %69 = vector.broadcast %1 : vector<16x1xf32> to vector<16x128xf32>
    %70 = arith.mulf %68, %69 : vector<16x128xf32>
    %cst_36 = arith.constant dense<0.000000e+00> : vector<16x128xf32>
    %71 = tpu.matmul %0, %70, %cst_36 {dimension_numbers = #tpu.dot_dimension_numbers<[1], [0], [0], [1], [0, 0, 1, 1], [], []>} : vector<16x16xf32>, vector<16x128xf32>, vector<16x128xf32> -> vector<16x128xf32>
    %72 = vector.broadcast %3 : vector<16x1xf32> to vector<16x128xf32>
    %73 = arith.addf %71, %72 : vector<16x128xf32>
    %cst_37 = arith.constant 5.000000e-01 : f32
    %74 = vector.broadcast %cst_37 : f32 to vector<16x128xf32>
    %75 = arith.mulf %74, %73 : vector<16x128xf32>
    %cst_38 = arith.constant 0.707106769 : f32
    %76 = vector.broadcast %cst_38 : f32 to vector<16x128xf32>
    %77 = arith.mulf %73, %76 : vector<16x128xf32>
    %78 = math.erf %77 : vector<16x128xf32>
    %cst_39 = arith.constant 1.000000e+00 : f32
    %79 = vector.broadcast %cst_39 : f32 to vector<16x128xf32>
    %80 = arith.addf %79, %78 : vector<16x128xf32>
    %81 = arith.mulf %75, %80 : vector<16x128xf32>
    %82 = vector.broadcast %2 : vector<16x1xf32> to vector<16x128xf32>
    %83 = arith.addf %70, %82 : vector<16x128xf32>
    %84 = arith.addf %83, %81 : vector<16x128xf32>
    %c3_40 = arith.constant 3 : index
    %c0_41 = arith.constant 0 : index
    %c0_42 = arith.constant 0 : index
    %85 = vector.load %arg7[%c3_40, %c0_41, %c0_42] : memref<8x16x128xf32, #tpu.memory_space<vmem>>, vector<1x16x128xf32>
    %86 = vector.shape_cast %85 : vector<1x16x128xf32> to vector<16x128xf32>
    %87 = vector.shape_cast %84 : vector<16x128xf32> to vector<1x16x128xf32>
    tpu.vector_store %arg7[%c3_40, %c0_41, %c0_42], %87 {strides = array<i32>} : memref<8x16x128xf32, #tpu.memory_space<vmem>>, vector<1x16x128xf32>,
    %c4 = arith.constant 4 : index
    %c0_43 = arith.constant 0 : index
    %c0_44 = arith.constant 0 : index
    %88 = vector.load %arg2[%c4, %c0_43, %c0_44] : memref<8x16x128xf32, #tpu.memory_space<vmem>>, vector<1x16x128xf32>
    %89 = vector.shape_cast %88 : vector<1x16x128xf32> to vector<16x128xf32>
    %90 = vector.broadcast %1 : vector<16x1xf32> to vector<16x128xf32>
    %91 = arith.mulf %89, %90 : vector<16x128xf32>
    %cst_45 = arith.constant dense<0.000000e+00> : vector<16x128xf32>
    %92 = tpu.matmul %0, %91, %cst_45 {dimension_numbers = #tpu.dot_dimension_numbers<[1], [0], [0], [1], [0, 0, 1, 1], [], []>} : vector<16x16xf32>, vector<16x128xf32>, vector<16x128xf32> -> vector<16x128xf32>
    %93 = vector.broadcast %3 : vector<16x1xf32> to vector<16x128xf32>
    %94 = arith.addf %92, %93 : vector<16x128xf32>
    %cst_46 = arith.constant 5.000000e-01 : f32
    %95 = vector.broadcast %cst_46 : f32 to vector<16x128xf32>
    %96 = arith.mulf %95, %94 : vector<16x128xf32>
    %cst_47 = arith.constant 0.707106769 : f32
    %97 = vector.broadcast %cst_47 : f32 to vector<16x128xf32>
    %98 = arith.mulf %94, %97 : vector<16x128xf32>
    %99 = math.erf %98 : vector<16x128xf32>
    %cst_48 = arith.constant 1.000000e+00 : f32
    %100 = vector.broadcast %cst_48 : f32 to vector<16x128xf32>
    %101 = arith.addf %100, %99 : vector<16x128xf32>
    %102 = arith.mulf %96, %101 : vector<16x128xf32>
    %103 = vector.broadcast %2 : vector<16x1xf32> to vector<16x128xf32>
    %104 = arith.addf %91, %103 : vector<16x128xf32>
    %105 = arith.addf %104, %102 : vector<16x128xf32>
    %c4_49 = arith.constant 4 : index
    %c0_50 = arith.constant 0 : index
    %c0_51 = arith.constant 0 : index
    %106 = vector.load %arg7[%c4_49, %c0_50, %c0_51] : memref<8x16x128xf32, #tpu.memory_space<vmem>>, vector<1x16x128xf32>
    %107 = vector.shape_cast %106 : vector<1x16x128xf32> to vector<16x128xf32>
    %108 = vector.shape_cast %105 : vector<16x128xf32> to vector<1x16x128xf32>
    tpu.vector_store %arg7[%c4_49, %c0_50, %c0_51], %108 {strides = array<i32>} : memref<8x16x128xf32, #tpu.memory_space<vmem>>, vector<1x16x128xf32>,
    %c5 = arith.constant 5 : index
    %c0_52 = arith.constant 0 : index
    %c0_53 = arith.constant 0 : index
    %109 = vector.load %arg2[%c5, %c0_52, %c0_53] : memref<8x16x128xf32, #tpu.memory_space<vmem>>, vector<1x16x128xf32>
    %110 = vector.shape_cast %109 : vector<1x16x128xf32> to vector<16x128xf32>
    %111 = vector.broadcast %1 : vector<16x1xf32> to vector<16x128xf32>
    %112 = arith.mulf %110, %111 : vector<16x128xf32>
    %cst_54 = arith.constant dense<0.000000e+00> : vector<16x128xf32>
    %113 = tpu.matmul %0, %112, %cst_54 {dimension_numbers = #tpu.dot_dimension_numbers<[1], [0], [0], [1], [0, 0, 1, 1], [], []>} : vector<16x16xf32>, vector<16x128xf32>, vector<16x128xf32> -> vector<16x128xf32>
    %114 = vector.broadcast %3 : vector<16x1xf32> to vector<16x128xf32>
    %115 = arith.addf %113, %114 : vector<16x128xf32>
    %cst_55 = arith.constant 5.000000e-01 : f32
    %116 = vector.broadcast %cst_55 : f32 to vector<16x128xf32>
    %117 = arith.mulf %116, %115 : vector<16x128xf32>
    %cst_56 = arith.constant 0.707106769 : f32
    %118 = vector.broadcast %cst_56 : f32 to vector<16x128xf32>
    %119 = arith.mulf %115, %118 : vector<16x128xf32>
    %120 = math.erf %119 : vector<16x128xf32>
    %cst_57 = arith.constant 1.000000e+00 : f32
    %121 = vector.broadcast %cst_57 : f32 to vector<16x128xf32>
    %122 = arith.addf %121, %120 : vector<16x128xf32>
    %123 = arith.mulf %117, %122 : vector<16x128xf32>
    %124 = vector.broadcast %2 : vector<16x1xf32> to vector<16x128xf32>
    %125 = arith.addf %112, %124 : vector<16x128xf32>
    %126 = arith.addf %125, %123 : vector<16x128xf32>
    %c5_58 = arith.constant 5 : index
    %c0_59 = arith.constant 0 : index
    %c0_60 = arith.constant 0 : index
    %127 = vector.load %arg7[%c5_58, %c0_59, %c0_60] : memref<8x16x128xf32, #tpu.memory_space<vmem>>, vector<1x16x128xf32>
    %128 = vector.shape_cast %127 : vector<1x16x128xf32> to vector<16x128xf32>
    %129 = vector.shape_cast %126 : vector<16x128xf32> to vector<1x16x128xf32>
    tpu.vector_store %arg7[%c5_58, %c0_59, %c0_60], %129 {strides = array<i32>} : memref<8x16x128xf32, #tpu.memory_space<vmem>>, vector<1x16x128xf32>,
    %c6 = arith.constant 6 : index
    %c0_61 = arith.constant 0 : index
    %c0_62 = arith.constant 0 : index
    %130 = vector.load %arg2[%c6, %c0_61, %c0_62] : memref<8x16x128xf32, #tpu.memory_space<vmem>>, vector<1x16x128xf32>
    %131 = vector.shape_cast %130 : vector<1x16x128xf32> to vector<16x128xf32>
    %132 = vector.broadcast %1 : vector<16x1xf32> to vector<16x128xf32>
    %133 = arith.mulf %131, %132 : vector<16x128xf32>
    %cst_63 = arith.constant dense<0.000000e+00> : vector<16x128xf32>
    %134 = tpu.matmul %0, %133, %cst_63 {dimension_numbers = #tpu.dot_dimension_numbers<[1], [0], [0], [1], [0, 0, 1, 1], [], []>} : vector<16x16xf32>, vector<16x128xf32>, vector<16x128xf32> -> vector<16x128xf32>
    %135 = vector.broadcast %3 : vector<16x1xf32> to vector<16x128xf32>
    %136 = arith.addf %134, %135 : vector<16x128xf32>
    %cst_64 = arith.constant 5.000000e-01 : f32
    %137 = vector.broadcast %cst_64 : f32 to vector<16x128xf32>
    %138 = arith.mulf %137, %136 : vector<16x128xf32>
    %cst_65 = arith.constant 0.707106769 : f32
    %139 = vector.broadcast %cst_65 : f32 to vector<16x128xf32>
    %140 = arith.mulf %136, %139 : vector<16x128xf32>
    %141 = math.erf %140 : vector<16x128xf32>
    %cst_66 = arith.constant 1.000000e+00 : f32
    %142 = vector.broadcast %cst_66 : f32 to vector<16x128xf32>
    %143 = arith.addf %142, %141 : vector<16x128xf32>
    %144 = arith.mulf %138, %143 : vector<16x128xf32>
    %145 = vector.broadcast %2 : vector<16x1xf32> to vector<16x128xf32>
    %146 = arith.addf %133, %145 : vector<16x128xf32>
    %147 = arith.addf %146, %144 : vector<16x128xf32>
    %c6_67 = arith.constant 6 : index
    %c0_68 = arith.constant 0 : index
    %c0_69 = arith.constant 0 : index
    %148 = vector.load %arg7[%c6_67, %c0_68, %c0_69] : memref<8x16x128xf32, #tpu.memory_space<vmem>>, vector<1x16x128xf32>
    %149 = vector.shape_cast %148 : vector<1x16x128xf32> to vector<16x128xf32>
    %150 = vector.shape_cast %147 : vector<16x128xf32> to vector<1x16x128xf32>
    tpu.vector_store %arg7[%c6_67, %c0_68, %c0_69], %150 {strides = array<i32>} : memref<8x16x128xf32, #tpu.memory_space<vmem>>, vector<1x16x128xf32>,
    %c7 = arith.constant 7 : index
    %c0_70 = arith.constant 0 : index
    %c0_71 = arith.constant 0 : index
    %151 = vector.load %arg2[%c7, %c0_70, %c0_71] : memref<8x16x128xf32, #tpu.memory_space<vmem>>, vector<1x16x128xf32>
    %152 = vector.shape_cast %151 : vector<1x16x128xf32> to vector<16x128xf32>
    %153 = vector.broadcast %1 : vector<16x1xf32> to vector<16x128xf32>
    %154 = arith.mulf %152, %153 : vector<16x128xf32>
    %cst_72 = arith.constant dense<0.000000e+00> : vector<16x128xf32>
    %155 = tpu.matmul %0, %154, %cst_72 {dimension_numbers = #tpu.dot_dimension_numbers<[1], [0], [0], [1], [0, 0, 1, 1], [], []>} : vector<16x16xf32>, vector<16x128xf32>, vector<16x128xf32> -> vector<16x128xf32>
    %156 = vector.broadcast %3 : vector<16x1xf32> to vector<16x128xf32>
    %157 = arith.addf %155, %156 : vector<16x128xf32>
    %cst_73 = arith.constant 5.000000e-01 : f32
    %158 = vector.broadcast %cst_73 : f32 to vector<16x128xf32>
    %159 = arith.mulf %158, %157 : vector<16x128xf32>
    %cst_74 = arith.constant 0.707106769 : f32
    %160 = vector.broadcast %cst_74 : f32 to vector<16x128xf32>
    %161 = arith.mulf %157, %160 : vector<16x128xf32>
    %162 = math.erf %161 : vector<16x128xf32>
    %cst_75 = arith.constant 1.000000e+00 : f32
    %163 = vector.broadcast %cst_75 : f32 to vector<16x128xf32>
    %164 = arith.addf %163, %162 : vector<16x128xf32>
    %165 = arith.mulf %159, %164 : vector<16x128xf32>
    %166 = vector.broadcast %2 : vector<16x1xf32> to vector<16x128xf32>
    %167 = arith.addf %154, %166 : vector<16x128xf32>
    %168 = arith.addf %167, %165 : vector<16x128xf32>
    %c7_76 = arith.constant 7 : index
    %c0_77 = arith.constant 0 : index
    %c0_78 = arith.constant 0 : index
    %169 = vector.load %arg7[%c7_76, %c0_77, %c0_78] : memref<8x16x128xf32, #tpu.memory_space<vmem>>, vector<1x16x128xf32>
    %170 = vector.shape_cast %169 : vector<1x16x128xf32> to vector<16x128xf32>
    %171 = vector.shape_cast %168 : vector<16x128xf32> to vector<1x16x128xf32>
    tpu.vector_store %arg7[%c7_76, %c0_77, %c0_78], %171 {strides = array<i32>} : memref<8x16x128xf32, #tpu.memory_space<vmem>>, vector<1x16x128xf32>,
    return
  }
  func.func @transform_0(%arg0: i32, %arg1: i32) -> (i32, i32, i32) {
    %c0_i32 = arith.constant 0 : i32
    %c0_i32_0 = arith.constant 0 : i32
    return %arg0, %c0_i32, %arg1 : i32, i32, i32
  }
  func.func @transform_1(%arg0: i32, %arg1: i32) -> (i32, i32) {
    %c0_i32 = arith.constant 0 : i32
    %c0_i32_0 = arith.constant 0 : i32
    %c0_i32_1 = arith.constant 0 : i32
    return %c0_i32, %c0_i32_0 : i32, i32
  }
  func.func @transform_2(%arg0: i32, %arg1: i32) -> (i32, i32) {
    %c0_i32 = arith.constant 0 : i32
    %c0_i32_0 = arith.constant 0 : i32
    %c0_i32_1 = arith.constant 0 : i32
    return %c0_i32, %c0_i32_0 : i32, i32
  }
  func.func @transform_3(%arg0: i32, %arg1: i32) -> (i32, i32) {
    %c0_i32 = arith.constant 0 : i32
    %c0_i32_0 = arith.constant 0 : i32
    %c0_i32_1 = arith.constant 0 : i32
    return %c0_i32, %c0_i32_0 : i32, i32
  }
  func.func @transform_4(%arg0: i32, %arg1: i32) -> (i32, i32) {
    %c0_i32 = arith.constant 0 : i32
    %c0_i32_0 = arith.constant 0 : i32
    %c0_i32_1 = arith.constant 0 : i32
    return %c0_i32, %c0_i32_0 : i32, i32
  }
  func.func @transform_5(%arg0: i32, %arg1: i32) -> (i32, i32, i32) {
    %c0_i32 = arith.constant 0 : i32
    %c0_i32_0 = arith.constant 0 : i32
    return %arg0, %c0_i32, %arg1 : i32, i32, i32
  }
}

</mosaic_0001>

<bundles_post_ra>
// kernel: tpu_custom_call.1
= control target key start
LH: loop header
LB: loop body
LE: loop exit
PB: predicated region body
PF: predicated region fallthrough
CT: control target
= control target key end

     0   :  { %10 = vsyncpa [#allocation3], 0  ;;  %s1402_s0 = inlined_call_operand.hbm [shape: f32[8,16,128], index: 0, kind: input, shape index: {}]   ;;  %s1403_s1 = inlined_call_operand.vmem [shape: f32[16,16], index: 1, kind: input, shape index: {}]   ;;  %s1404_s2 = inlined_call_operand.vmem [shape: f32[16,1], index: 2, kind: input, shape index: {}]   ;;  %s1405_s3 = inlined_call_operand.vmem [shape: f32[16,1], index: 3, kind: input, shape index: {}]   ;;  %s1406_s4 = inlined_call_operand.vmem [shape: f32[16,1], index: 4, kind: input, shape index: {}]   ;;  %s1407_s5 = inlined_call_operand.hbm [shape: f32[8,16,128], index: 5, kind: output, shape index: {}]  }
   0x1   :  { %11 = vsyncpa [#allocation4], 0  ;;  %s1094_s18 = smov [#allocation2]   ;;  %s1046_s22 = scalar_lea.hbm %s1402_s0, 2048 }
   0x2   :  { %s17_s19 = sshll.u32 %s1094_s18, 4  ;;  %p1047_p0 = scmp.ne.s32.totalorder %s1402_s0, %s1046_s22  ;;  %s18_s19 = int_to_ptr.vmem [resolvable:$true] %s17_s19 }
   0x3   :  { %p1050_p1 = scmp.lt.u32.totalorder %s1046_s22, %s1402_s0 }
   0x5   :  { %p1052_p2 = pnand %p1050_p1, %p1047_p0 }
   0x7   :  { %1055 = shalt.err (!%p1052_p2)
}
   0x8   :  { %s1056_s27 = scalar_lea.vmem %s18_s19, 2048  ;;  %p1061_p4 = scmp.lt.s32.totalorder %s18_s19, %s18_s19 }
   0x9   :  { %p1057_p3 = scmp.ne.s32.totalorder %s18_s19, %s1056_s27  ;;  %p1062_p5 = scmp.lt.s32.totalorder %s1056_s27, %s1056_s27 }
   0xb   :  { %p1063_p6 = por %p1062_p5, %p1061_p4 }
   0xd   :  { %p1064_p7 = pnand %p1063_p6, %p1057_p3 }
   0xf   :  { %1067 = shalt.err (!%p1064_p7)
}
  0x10   :  { %s1095_s28 = smov 128   ;;  %s1096_s29 = smov 8  }
  0x11   :  { %23 = dma.hbm_to_vmem [thread:$0]  %s1402_s0, 2048, %s18_s19, [#allocation3], %s1095_s28, %s1095_s28, %s1096_s29  }
  0x12   :  { %1090 = dma.done.wait [#allocation3], 2048  }
  0x13   :  { %1091 = vsyncadd [#allocation3], 4294965248  ;;  %v1097_v0 = vmov 0   ;;  %v41_v1 = vld [vmem:[%s1406_s4] sm:$0xff]  ;;  %v42_v3 = vld [vmem:[%s1406_s4 + $0x8] sm:$0xff]  ;;  %vm67_vm0 = vcmask 130048  }
  0x14   :  { %1013 = vset.pattern.permute.xlu1 %v1097_v0  ;;  %1012 = vset.pattern.permute.xlu0 %v1097_v0  ;;  %v37_v2 = vld [vmem:[%s1404_s2] sm:$0xff]  ;;  %v38_v4 = vld [vmem:[%s1404_s2 + $0x8] sm:$0xff]  ;;  %v176_v11 = vld [vmem:[#allocation2 + $0x10] sm:$0xff] }
  0x15   :  { %59 = vperm.xlu1 %1013, %v41_v1   ;;  %47 = vperm.xlu0 %1012, %v37_v2   ;;  %v40_v5 = vld [vmem:[%s1405_s3 + $0x8] sm:$0xff]  ;;  %v39_v6 = vld [vmem:[%s1405_s3] sm:$0xff]  ;;  %v177_v12 = vld [vmem:[#allocation2 + $0x18] sm:$0xff] }
  0x16   :  { %v1165_v7 = vld [vmem:[%s1403_s1] sm:$0xff]  ;;  %v44_v10 = vld [vmem:[#allocation2 + $0x8] sm:$0xff]  ;;  %v371_v14 = vld [vmem:[#allocation2 + $0x38] sm:$0xff] }
  0x17   :  { %923 = vmatprep.mubr.msk.f32.mxu0 %vm67_vm0, %v1165_v7  ;;  %930 = vmatprep.mubr.msk.f32.mxu1 %vm67_vm0, %v1165_v7  ;;  %v43_v9 = vld [vmem:[#allocation2] sm:$0xff]  ;;  %v274_v13 = vld [vmem:[#allocation2 + $0x28] sm:$0xff]  ;;  %v370_v19 = vld [vmem:[#allocation2 + $0x30] sm:$0xff] }
  0x18   :  { %v273_v18 = vld [vmem:[#allocation2 + $0x20] sm:$0xff]  ;;  %v468_v24 = vld [vmem:[#allocation2 + $0x48] sm:$0xff]  ;;  %v565_v25 = vld [vmem:[#allocation2 + $0x58] sm:$0xff] }
  0x19   :  { %64 = vperm.xlu1 %1013, %v42_v3   ;;  %52 = vperm.xlu0 %1012, %v38_v4   ;;  %v467_v30 = vld [vmem:[#allocation2 + $0x40] sm:$0xff]  ;;  %v564_v32 = vld [vmem:[#allocation2 + $0x50] sm:$0xff]  ;;  %v662_v36 = vld [vmem:[#allocation2 + $0x68] sm:$0xff] }
  0x1a   :  { %v36_v37 = vld [vmem:[%s1403_s1 + $0x8] sm:$0xff]  ;;  %v759_v38 = vld [vmem:[#allocation2 + $0x78] sm:$0xff]  ;;  %v661_v41 = vld [vmem:[#allocation2 + $0x60] sm:$0xff]  ;;  %s1098_s1 = smov [#allocation5]  }
  0x1b   :  { %v758_v43 = vld [vmem:[#allocation2 + $0x70] sm:$0xff]  ;;  %s859_s4 = sshll.u32 %s1098_s1, 4  ;;  %s860_s4 = int_to_ptr.vmem [resolvable:$true] %s859_s4 }
  0x1c   :  { %s1068_s20 = scalar_lea.vmem %s860_s4, 2048  ;;  %p1073_p9 = scmp.lt.s32.totalorder %s860_s4, %s860_s4 }
  0x1d   :  { %166 = vperm.xlu1 %1013, %v40_v5   ;;  %161 = vperm.xlu0 %1012, %v39_v6   ;;  %p1069_p8 = scmp.ne.s32.totalorder %s860_s4, %s1068_s20  ;;  %p1074_p10 = scmp.lt.s32.totalorder %s1068_s20, %s1068_s20 }
  0x1f   :  { %p1075_p11 = por %p1074_p10, %p1073_p9 }
  0x21   :  { %p1076_p12 = pnand %p1075_p11, %p1069_p8 }
  0x94   :  { %v48_v8 = vpop.permute.xlu0 %47  ;;  %v1242_v51 = vpop.permute.xlu1 %59 }
  0x95   :  { %v1171_v16 = vmul.f32 %v48_v8, %v43_v9  ;;  %v1173_v17 = vmul.f32 %v176_v11, %v48_v8  ;;  %v1187_v28 = vmul.f32 %v273_v18, %v48_v8  ;;  %v1189_v29 = vmul.f32 %v370_v19, %v48_v8 }
  0x96   :  { %v1202_v39 = vmul.f32 %v467_v30, %v48_v8  ;;  %v1204_v40 = vmul.f32 %v564_v32, %v48_v8  ;;  %v1216_v47 = vmul.f32 %v661_v41, %v48_v8  ;;  %v1218_v48 = vmul.f32 %v758_v43, %v48_v8 }
  0x98   :  { %v53_v15 = vpop.permute.xlu0 %52  ;;  %v1244_v52 = vpop.permute.xlu1 %64 }
  0x99   :  { %v1175_v20 = vmul.f32 %v53_v15, %v44_v10  ;;  %v1177_v21 = vmul.f32 %v177_v12, %v53_v15  ;;  %v1179_v22 = vmul.f32 %v274_v13, %v53_v15  ;;  %v1181_v23 = vmul.f32 %v371_v14, %v53_v15 }
  0x9a   :  { %v1191_v31 = vmul.f32 %v468_v24, %v53_v15  ;;  %v1197_v35 = vmul.f32 %v565_v25, %v53_v15  ;;  %v1206_v42 = vmul.f32 %v662_v36, %v53_v15  ;;  %v1214_v46 = vmul.f32 %v759_v38, %v53_v15 }
  0x9b   :  { %v975_v26 = vpack.c.bf16 %v1175_v20, %v1171_v16  ;;  %v979_v27 = vpack.c.bf16 %v1177_v21, %v1173_v17  ;;  %v983_v33 = vpack.c.bf16 %v1179_v22, %v1187_v28  ;;  %v987_v34 = vpack.c.bf16 %v1181_v23, %v1189_v29 }
  0x9c   :  { %v991_v44 = vpack.c.bf16 %v1191_v31, %v1202_v39  ;;  %v995_v45 = vpack.c.bf16 %v1197_v35, %v1204_v40  ;;  %v999_v49 = vpack.c.bf16 %v1206_v42, %v1216_v47  ;;  %v1003_v50 = vpack.c.bf16 %v1214_v46, %v1218_v48  ;;  %v1248_v59 = vpop.permute.xlu0 %161  ;;  %v1256_v62 = vpop.permute.xlu1 %166 }
  0x9d   :  { %976 = vmatprep.subr.bf16.mxu0 %v975_v26  ;;  %980 = vmatprep.subr.bf16.mxu1 %v979_v27  ;;  %v1262_v3 = vadd.f32 %v1248_v59, %v1171_v16  ;;  %v1266_v6 = vadd.f32 %v1256_v62, %v1175_v20  ;;  %v1276_v11 = vadd.f32 %v1173_v17, %v1248_v59 }
  0x9e   :  { %978 = vmatpush3.bf16.msra.mxu0 %v975_v26  ;;  %982 = vmatpush3.bf16.msra.mxu1 %v979_v27  ;;  %v1286_v14 = vadd.f32 %v1177_v21, %v1256_v62  ;;  %v1290_v15 = vadd.f32 %v1187_v28, %v1248_v59  ;;  %v1295_v19 = vadd.f32 %v1179_v22, %v1256_v62 }
  0x9f   :  { %984 = vmatprep.subr.bf16.mxu0 %v983_v33  ;;  %988 = vmatprep.subr.bf16.mxu1 %v987_v34  ;;  %v1299_v20 = vadd.f32 %v1189_v29, %v1248_v59  ;;  %v1312_v30 = vadd.f32 %v1181_v23, %v1256_v62  ;;  %v1331_v38 = vadd.f32 %v1204_v40, %v1248_v59 }
  0xa1   :  { %924 = vmatmul.mubr.msk.f32.vlgmr.msra.gmra.mrb[0].mxu0 %vm67_vm0, %v36_v37  ;;  %931 = vmatmul.mubr.msk.f32.vlgmr.msra.gmra.mrb[0].mxu1 %vm67_vm0, %v36_v37 }
  0xa2   :  { %986 = vmatpush3.bf16.msra.mxu0 %v983_v33  ;;  %990 = vmatpush3.bf16.msra.mxu1 %v987_v34  ;;  %v1322_v33 = vadd.f32 %v1202_v39, %v1248_v59  ;;  %v1326_v34 = vadd.f32 %v1191_v31, %v1256_v62 }
  0xa3   :  { %992 = vmatprep.subr.bf16.mxu0 %v991_v44  ;;  %996 = vmatprep.subr.bf16.mxu1 %v995_v45 }
  0xa4   :  { %937 = vmatprep.mubr.msk.f32.mxu0 %vm67_vm0, %v1165_v7  ;;  %944 = vmatprep.mubr.msk.f32.mxu1 %vm67_vm0, %v1165_v7 }
  0xa5   :  { %938 = vmatmul.mubr.msk.f32.vlgmr.msra.gmra.mrb[2].mxu0 %vm67_vm0, %v36_v37  ;;  %945 = vmatmul.mubr.msk.f32.vlgmr.msra.gmra.mrb[2].mxu1 %vm67_vm0, %v36_v37 }
  0xa6   :  { %994 = vmatpush3.bf16.msra.mxu0 %v991_v44  ;;  %998 = vmatpush3.bf16.msra.mxu1 %v995_v45 }
  0xa7   :  { %1000 = vmatprep.subr.bf16.mxu0 %v999_v49  ;;  %1004 = vmatprep.subr.bf16.mxu1 %v1003_v50 }
  0xa8   :  { %951 = vmatprep.mubr.msk.f32.mxu0 %vm67_vm0, %v1165_v7  ;;  %958 = vmatprep.mubr.msk.f32.mxu1 %vm67_vm0, %v1165_v7 }
  0xa9   :  { %952 = vmatmul.mubr.msk.f32.vlgmr.msra.gmra.mrb[4].mxu0 %vm67_vm0, %v36_v37  ;;  %959 = vmatmul.mubr.msk.f32.vlgmr.msra.gmra.mrb[4].mxu1 %vm67_vm0, %v36_v37 }
  0xaa   :  { %1002 = vmatpush3.bf16.msra.mxu0 %v999_v49  ;;  %1006 = vmatpush3.bf16.msra.mxu1 %v1003_v50 }
  0xab   :  { %965 = vmatprep.mubr.msk.f32.mxu0 %vm67_vm0, %v1165_v7  ;;  %972 = vmatprep.mubr.msk.f32.mxu1 %vm67_vm0, %v1165_v7 }
  0xad   :  { %966 = vmatmul.mubr.msk.f32.vlgmr.msra.gmra.mrb[6].mxu0 %vm67_vm0, %v36_v37  ;;  %973 = vmatmul.mubr.msk.f32.vlgmr.msra.gmra.mrb[6].mxu1 %vm67_vm0, %v36_v37 }
 0x174   :  { %v925_v53 = vpop.f32.mrb[0].mxu0  ;;  %v932_v54 = vpop.f32.mrb[0].mxu1 }
 0x175   :  { %v146_v55 = vadd.f32 %v925_v53, %v1244_v52  ;;  %v252_v56 = vadd.f32 %v932_v54, %v1244_v52  ;;  %v140_v57 = vpop.f32.mrb[1].mxu0  ;;  %v246_v58 = vpop.f32.mrb[1].mxu1 }
 0x176   :  { %v1251_v60 = vadd.f32 %v140_v57, %v1242_v51  ;;  %v1254_v61 = vadd.f32 %v246_v58, %v1242_v51 }
 0x177   :  { %v152_v63 = vmul.f32 0.70710677, %v146_v55  ;;  %v258_v0 = vmul.f32 0.70710677, %v252_v56  ;;  %v150_v44 = vmul.f32 0.5, %v146_v55  ;;  %v256_v53 = vmul.f32 0.5, %v252_v56 }
 0x178   :  { %v151_v1 = vmul.f32 0.70710677, %v1251_v60  ;;  %v257_v2 = vmul.f32 0.70710677, %v1254_v61  ;;  %v939_v4 = vpop.f32.mrb[2].mxu0  ;;  %v946_v5 = vpop.f32.mrb[2].mxu1 }
 0x179   :  { %1014 = verf.f32 %v152_v63  ;;  %v1269_v7 = vadd.f32 %v939_v4, %v1244_v52  ;;  %v1272_v8 = vadd.f32 %v946_v5, %v1244_v52  ;;  %v343_v9 = vpop.f32.mrb[3].mxu0  ;;  %v440_v10 = vpop.f32.mrb[3].mxu1 }
 0x17a   :  { %1016 = verf.f32 %v258_v0  ;;  %v1279_v12 = vadd.f32 %v343_v9, %v1242_v51  ;;  %v1282_v13 = vadd.f32 %v440_v10, %v1242_v51  ;;  %v255_v9 = vmul.f32 0.5, %v1254_v61 }
 0x17b   :  { %1018 = verf.f32 %v151_v1  ;;  %v355_v16 = vmul.f32 0.70710677, %v1269_v7  ;;  %v452_v21 = vmul.f32 0.70710677, %v1272_v8 }
 0x17c   :  { %1020 = verf.f32 %v257_v2  ;;  %v953_v17 = vpop.f32.mrb[4].mxu0  ;;  %v960_v18 = vpop.f32.mrb[4].mxu1  ;;  %v354_v24 = vmul.f32 0.70710677, %v1279_v12  ;;  %v451_v25 = vmul.f32 0.70710677, %v1282_v13 }
 0x17d   :  { %1022 = verf.f32 %v355_v16  ;;  %v1305_v26 = vadd.f32 %v953_v17, %v1244_v52  ;;  %v1308_v27 = vadd.f32 %v960_v18, %v1244_v52  ;;  %v537_v28 = vpop.f32.mrb[5].mxu0  ;;  %v634_v22 = vpop.f32.mrb[5].mxu1  ;;  %v149_v2 = vmul.f32 0.5, %v1251_v60 }
 0x17e   :  { %1024 = verf.f32 %v452_v21  ;;  %v1315_v29 = vadd.f32 %v537_v28, %v1242_v51  ;;  %v1318_v32 = vadd.f32 %v634_v22, %v1242_v51  ;;  %v353_v60 = vmul.f32 0.5, %v1269_v7 }
 0x17f   :  { %1026 = verf.f32 %v354_v24  ;;  %v549_v36 = vmul.f32 0.70710677, %v1305_v26  ;;  %v646_v41 = vmul.f32 0.70710677, %v1308_v27 }
 0x180   :  { %v967_v23 = vpop.f32.mrb[6].mxu0  ;;  %v974_v37 = vpop.f32.mrb[6].mxu1  ;;  %1028 = verf.f32 %v451_v25  ;;  %v548_v43 = vmul.f32 0.70710677, %v1315_v29  ;;  %v645_v31 = vmul.f32 0.70710677, %v1318_v32 }
 0x181   :  { %v731_v39 = vpop.f32.mrb[7].mxu0  ;;  %1030 = verf.f32 %v549_v36  ;;  %v1337_v45 = vadd.f32 %v967_v23, %v1244_v52  ;;  %v828_v49 = vpop.f32.mrb[7].mxu1  ;;  %v1340_v40 = vadd.f32 %v974_v37, %v1244_v52  ;;  %v450_v37 = vmul.f32 0.5, %v1272_v8 }
 0x182   :  { %1032 = verf.f32 %v646_v41  ;;  %v1343_v54 = vadd.f32 %v731_v39, %v1242_v51  ;;  %v1347_v63 = vadd.f32 %v828_v49, %v1242_v51  ;;  %v352_v39 = vmul.f32 0.5, %v1279_v12 }
 0x183   :  { %v1015_v50 = vpop.eup %1014  ;;  %1034 = verf.f32 %v548_v43  ;;  %v743_v55 = vmul.f32 0.70710677, %v1337_v45  ;;  %v840_v56 = vmul.f32 0.70710677, %v1340_v40 }
 0x184   :  { %v1017_v57 = vpop.eup %1016  ;;  %v156_v58 = vadd.f32 1.0, %v1015_v50  ;;  %1036 = verf.f32 %v645_v31  ;;  %v742_v17 = vmul.f32 0.70710677, %v1343_v54  ;;  %v839_v24 = vmul.f32 0.70710677, %v1347_v63 }
 0x185   :  { %v1019_v0 = vpop.eup %1018  ;;  %v262_v1 = vadd.f32 1.0, %v1017_v57  ;;  %1038 = verf.f32 %v743_v55  ;;  %v654_v31 = vadd.f32 %v1197_v35, %v1256_v62 }
 0x186   :  { %v1021_v52 = vpop.eup %1020  ;;  %v158_v4 = vmul.f32 %v156_v58, %v150_v44  ;;  %v155_v5 = vadd.f32 1.0, %v1019_v0  ;;  %1040 = verf.f32 %v840_v56 }
 0x187   :  { %v264_v10 = vmul.f32 %v262_v1, %v256_v53  ;;  %v261_v16 = vadd.f32 1.0, %v1021_v52  ;;  %v1023_v51 = vpop.eup %1022  ;;  %1042 = verf.f32 %v742_v17  ;;  %v644_v1 = vmul.f32 0.5, %v1308_v27 }
 0x188   :  { %v172_v18 = vadd.f32 %v1266_v6, %v158_v4  ;;  %v157_v21 = vmul.f32 %v155_v5, %v149_v2  ;;  %v1025_v25 = vpop.eup %1024  ;;  %v359_v36 = vadd.f32 1.0, %v1023_v51  ;;  %1044 = verf.f32 %v839_v24 }
 0x189   :  { %v268_v28 = vadd.f32 %v1286_v14, %v264_v10  ;;  %v263_v22 = vmul.f32 %v261_v16, %v255_v9  ;;  %v1027_v61 = vpop.eup %1026  ;;  %v456_v41 = vadd.f32 1.0, %v1025_v25  ;;  %v546_v52 = vmul.f32 0.5, %v1315_v29 }
 0x18a   :  { %174 = vst [vmem:[#allocation5 + $0x8] sm:$0xff] %v172_v18  ;;  %v171_v23 = vadd.f32 %v1262_v3, %v157_v21  ;;  %v1029_v6 = vpop.eup %1028  ;;  %v361_v43 = vmul.f32 %v359_v36, %v353_v60  ;;  %v358_v44 = vadd.f32 1.0, %v1027_v61  ;;  %v449_v3 = vmul.f32 0.5, %v1282_v13 }
 0x18b   :  { %271 = vst [vmem:[#allocation5 + $0x18] sm:$0xff] %v268_v28  ;;  %v267_v7 = vadd.f32 %v1276_v11, %v263_v22  ;;  %v1031_v14 = vpop.eup %1030  ;;  %v458_v49 = vmul.f32 %v456_v41, %v450_v37  ;;  %v455_v50 = vadd.f32 1.0, %v1029_v6  ;;  %v547_v11 = vmul.f32 0.5, %v1305_v26 }
 0x18c   :  { %173 = vst [vmem:[#allocation5] sm:$0xff] %v171_v23  ;;  %v1033_v8 = vpop.eup %1032  ;;  %v365_v53 = vadd.f32 %v1295_v19, %v361_v43  ;;  %v360_v57 = vmul.f32 %v358_v44, %v352_v39  ;;  %v553_v58 = vadd.f32 1.0, %v1031_v14  ;;  %v643_v9 = vmul.f32 0.5, %v1318_v32 }
 0x18d   :  { %270 = vst [vmem:[#allocation5 + $0x10] sm:$0xff] %v267_v7  ;;  %v1035_v55 = vpop.eup %1034  ;;  %v462_v12 = vadd.f32 %v1312_v30, %v458_v49  ;;  %v457_v0 = vmul.f32 %v455_v50, %v449_v3  ;;  %v650_v35 = vadd.f32 1.0, %v1033_v8  ;;  %v741_v17 = vmul.f32 0.5, %v1337_v45 }
 0x18e   :  { %v1037_v2 = vpop.eup %1036  ;;  %368 = vst [vmem:[#allocation5 + $0x28] sm:$0xff] %v365_v53  ;;  %v364_v13 = vadd.f32 %v1290_v15, %v360_v57  ;;  %v555_v56 = vmul.f32 %v553_v58, %v547_v11  ;;  %v552_v4 = vadd.f32 1.0, %v1035_v55  ;;  %v838_v18 = vmul.f32 0.5, %v1340_v40 }
 0x18f   :  { %v1039_v19 = vpop.eup %1038  ;;  %465 = vst [vmem:[#allocation5 + $0x38] sm:$0xff] %v462_v12  ;;  %v461_v26 = vadd.f32 %v1299_v20, %v457_v0  ;;  %v652_v5 = vmul.f32 %v650_v35, %v644_v1  ;;  %v649_v30 = vadd.f32 1.0, %v1037_v2  ;;  %v751_v20 = vadd.f32 %v1206_v42, %v1256_v62 }
 0x190   :  { %v1041_v10 = vpop.eup %1040  ;;  %367 = vst [vmem:[#allocation5 + $0x20] sm:$0xff] %v364_v13  ;;  %v559_v27 = vadd.f32 %v1326_v34, %v555_v56  ;;  %v554_v16 = vmul.f32 %v552_v4, %v546_v52  ;;  %v747_v15 = vadd.f32 1.0, %v1039_v19  ;;  %v848_v32 = vadd.f32 %v1214_v46, %v1256_v62 }
 0x191   :  { %464 = vst [vmem:[#allocation5 + $0x30] sm:$0xff] %v461_v26  ;;  %v656_v51 = vadd.f32 %v654_v31, %v652_v5  ;;  %v651_v29 = vmul.f32 %v649_v30, %v643_v9  ;;  %v844_v21 = vadd.f32 1.0, %v1041_v10  ;;  %v1043_v60 = vpop.eup %1042  ;;  %v740_v22 = vmul.f32 0.5, %v1343_v54 }
 0x192   :  { %562 = vst [vmem:[#allocation5 + $0x48] sm:$0xff] %v559_v27  ;;  %v558_v34 = vadd.f32 %v1322_v33, %v554_v16  ;;  %v749_v24 = vmul.f32 %v747_v15, %v741_v17  ;;  %v1045_v25 = vpop.eup %1044  ;;  %v746_v40 = vadd.f32 1.0, %v1043_v60  ;;  %v837_v61 = vmul.f32 0.5, %v1347_v63 }
 0x193   :  { %659 = vst [vmem:[#allocation5 + $0x58] sm:$0xff] %v656_v51  ;;  %v655_v45 = vadd.f32 %v1331_v38, %v651_v29  ;;  %v846_v28 = vmul.f32 %v844_v21, %v838_v18  ;;  %v843_v42 = vadd.f32 1.0, %v1045_v25  ;;  %v750_v46 = vadd.f32 %v1216_v47, %v1248_v59 }
 0x194   :  { %561 = vst [vmem:[#allocation5 + $0x40] sm:$0xff] %v558_v34  ;;  %v753_v36 = vadd.f32 %v751_v20, %v749_v24  ;;  %v748_v33 = vmul.f32 %v746_v40, %v740_v22  ;;  %v847_v38 = vadd.f32 %v1218_v48, %v1248_v59 }
 0x195   :  { %658 = vst [vmem:[#allocation5 + $0x50] sm:$0xff] %v655_v45  ;;  %v850_v62 = vadd.f32 %v848_v32, %v846_v28  ;;  %v845_v23 = vmul.f32 %v843_v42, %v837_v61 }
 0x196   :  { %756 = vst [vmem:[#allocation5 + $0x68] sm:$0xff] %v753_v36  ;;  %v752_v54 = vadd.f32 %v750_v46, %v748_v33 }
 0x197   :  { %853 = vst [vmem:[#allocation5 + $0x78] sm:$0xff] %v850_v62  ;;  %v849_v37 = vadd.f32 %v847_v38, %v845_v23 }
 0x198   :  { %755 = vst [vmem:[#allocation5 + $0x60] sm:$0xff] %v752_v54 }
 0x199   :  { %852 = vst [vmem:[#allocation5 + $0x70] sm:$0xff] %v849_v37 }
 0x19a   :  { %1079 = shalt.err (!%p1076_p12)
}
 0x19b   :  { %s1080_s23 = scalar_lea.hbm %s1407_s5, 2048 }
 0x19c   :  { %p1081_p13 = scmp.ne.s32.totalorder %s1407_s5, %s1080_s23  ;;  %p1084_p0 = scmp.lt.u32.totalorder %s1080_s23, %s1407_s5 }
 0x19e   :  { %p1086_p1 = pnand %p1084_p0, %p1081_p13 }
 0x1a0   :  { %1089 = shalt.err (!%p1086_p1)
}
 0x1a1   :  { %865 = dma.vmem_to_hbm [thread:$0]  %s860_s4, 2048, %s1407_s5, [#allocation4], %s1095_s28, %s1095_s28, %s1096_s29  }
 0x1a2   :  { %1092 = dma.done.wait [#allocation4], 2048  }
 0x1a3   :  { %1093 = vsyncadd [#allocation4], 4294965248 }
 0x1a4   :  { %869 = vsyncpa [#allocation3], 1 }
 0x1a5   :  { %870 = vsyncpa [#allocation4], 1 }

</bundles_post_ra>
